<compile_context>
chip_gen: v7x
topology: tpu7x:2x2x1
jax: 0.10.0
libtpu: 0.0.40
codegen_flags: <defaults>
</compile_context>

<pallas_src>
import functools

import jax
import jax.numpy as jnp
from jax.experimental import pallas as pl
from jax.experimental.pallas import tpu as pltpu


def decoder_kernel(x_ref, w1_ref, w2_ref, o_ref):
    # x_ref:  (tm, In)      VMEM tile of the input batch (native dtype, e.g. bf16)
    # w1_ref: (In, Hidden)  full first-layer weight (transposed), grid-invariant
    # w2_ref: (Hidden, Out) full second-layer weight (transposed), grid-invariant
    # o_ref:  (tm, Out)     output tile
    # First linear layer on the MXU, f32 accumulation (no operand upcast).
    h = jnp.dot(x_ref[...], w1_ref[...], preferred_element_type=jnp.float32)

    # LeakyReLU(negative_slope=0.2) on the VPU, in f32.
    h = jnp.where(h > 0, h, 0.2 * h)

    # Second linear layer on the MXU; cast the activation to the weight dtype so the
    # matmul stays on the fast (e.g. bf16) MXU path. No-op if weights are f32.
    y = jnp.dot(h.astype(w2_ref.dtype), w2_ref[...],
                preferred_element_type=jnp.float32)

    o_ref[...] = y.astype(o_ref.dtype)


def _round_up(x, m):
    return (x + m - 1) // m * m


def _select_tile_m(B, tm):
    """Pick a batch tile: multiple of 8, <= padded batch, >= 2 grid steps when possible."""
    tm = max(8, (int(tm) // 8) * 8)
    bp = _round_up(B, 8)
    tm = min(tm, bp)
    # Prefer at least 2 grid steps so the batch axis can shard across v7x's 2 TensorCores.
    if B > 8 and pl.cdiv(bp, tm) < 2:
        tm = max(8, _round_up(pl.cdiv(bp, 2), 8))
    return tm


@functools.partial(jax.jit, static_argnames=("tm",))
def decoder_forward(x, w1_t, w2_t, *, tm=256):
    """x: (B, In); w1_t: (In, Hidden); w2_t: (Hidden, Out) -> (B, Out)."""
    B, In = x.shape
    Hidden, Out = w2_t.shape
    assert w1_t.shape == (In, Hidden)

    tm = _select_tile_m(B, tm)
    grid_m = pl.cdiv(B, tm)
    Bp = grid_m * tm
    if Bp != B:
        # Pad the batch with zeros instead of forcing a tiny tile everywhere.
        x = jnp.pad(x, ((0, Bp - B), (0, 0)))

    isz = lambda a: jnp.dtype(a.dtype).itemsize
    # VMEM budget: single-buffered weights + double-buffered x/out tiles + f32 activations.
    w_bytes = In * Hidden * isz(w1_t) + Hidden * Out * isz(w2_t)
    io_bytes = 2 * tm * (In * isz(x) + Out * isz(x))
    act_bytes = tm * Hidden * 4 + tm * Out * 4
    total_bytes = w_bytes + io_bytes + act_bytes
    vmem_limit = min(max(2 * total_bytes, 32 * 1024 * 1024), 60 * 1024 * 1024)

    cost = pl.CostEstimate(
        flops=2 * Bp * In * Hidden + 2 * Bp * Hidden * Out,
        transcendentals=0,
        bytes_accessed=(Bp * In * isz(x) + In * Hidden * isz(w1_t)
                        + Hidden * Out * isz(w2_t) + Bp * Out * isz(x)),
    )

    out = pl.pallas_call(
        decoder_kernel,
        out_shape=jax.ShapeDtypeStruct((Bp, Out), x.dtype),
        grid_spec=pltpu.PrefetchScalarGridSpec(
            num_scalar_prefetch=0,
            grid=(grid_m,),
            in_specs=[
                # Batch tile of the input (double-buffered by default).
                pl.BlockSpec((tm, In), lambda i: (i, 0)),
                # Whole weight matrices, grid-invariant -> single-buffered to save VMEM.
                pl.BlockSpec((In, Hidden), lambda i: (0, 0),
                             pipeline_mode=pl.Buffered(1)),
                pl.BlockSpec((Hidden, Out), lambda i: (0, 0),
                             pipeline_mode=pl.Buffered(1)),
            ],
            out_specs=pl.BlockSpec((tm, Out), lambda i: (i, 0)),
        ),
        compiler_params=pltpu.CompilerParams(
            dimension_semantics=("parallel",),
            vmem_limit_bytes=int(vmem_limit),
        ),
        cost_estimate=cost,
    )(x, w1_t, w2_t)

    return out[:B] if Bp != B else out


def init_decoder_params(key, input_dim, hidden_dim, output_dim, dtype=jnp.float32):
    """Deterministic synthetic init mirroring nn.Linear(bias=False) shapes.

    PyTorch stores weight as (out, in); we keep that convention for the params
    and transpose when feeding the kernel.
    """
    k1, k2 = jax.random.split(key)
    bound1 = 1.0 / jnp.sqrt(input_dim)
    bound2 = 1.0 / jnp.sqrt(hidden_dim)
    w1 = jax.random.uniform(k1, (hidden_dim, input_dim), dtype, -bound1, bound1)
    w2 = jax.random.uniform(k2, (output_dim, hidden_dim), dtype, -bound2, bound2)
    return w1, w2


if __name__ == "__main__":
    # Small shapes consistent with Decoder(Input_dim, Hidden_dim, Output_dim).
    B, INPUT_DIM, HIDDEN_DIM, OUTPUT_DIM = 256, 256, 128, 128

    key = jax.random.PRNGKey(0)
    kx, kp = jax.random.split(key)
    x = jax.random.normal(kx, (B, INPUT_DIM), jnp.float32)
    w1, w2 = init_decoder_params(kp, INPUT_DIM, HIDDEN_DIM, OUTPUT_DIM)

    # Feed the kernel bf16 operands (fast MXU path, f32 accumulation inside the kernel).
    xb = x.astype(jnp.bfloat16)
    w1b = w1.astype(jnp.bfloat16)
    w2b = w2.astype(jnp.bfloat16)

    out = decoder_forward(xb, w1b.T, w2b.T)
    out = jax.block_until_ready(out)

    # Pure-JAX reference using the same arithmetic (bf16 operands, f32 accumulation).
    h_ref = jnp.dot(xb, w1b.T, preferred_element_type=jnp.float32)
    h_ref = jnp.where(h_ref > 0, h_ref, 0.2 * h_ref)
    ref = jnp.dot(h_ref.astype(jnp.bfloat16), w2b.T,
                  preferred_element_type=jnp.float32)

    # Loose sanity check against the full-f32 PyTorch-semantics forward as well.
    h32 = x @ w1.T
    h32 = jnp.where(h32 > 0, h32, 0.2 * h32)
    ref32 = h32 @ w2.T

    out32 = out.astype(jnp.float32)
    assert out.shape == (B, OUTPUT_DIM)
    assert jnp.allclose(out32, ref, atol=2e-2, rtol=2e-2)
    assert jnp.allclose(out32, ref32, atol=5e-2, rtol=5e-2)

    print("KERNEL_OK")
</pallas_src>

<mosaic_0001>
module attributes {stable_mosaic.version = 11 : i64} {
  func.func @decoder_kernel(%arg0: i32, %arg1: memref<128x256xbf16, #tpu.memory_space<vmem>>, %arg2: memref<256x128xbf16, #tpu.memory_space<vmem>>, %arg3: memref<128x128xbf16, #tpu.memory_space<vmem>>, %arg4: memref<128x128xbf16, #tpu.memory_space<vmem>>) attributes {dimension_semantics = [#tpu.dimension_semantics<parallel>], iteration_bounds = array<i64: 2>, scalar_prefetch = 0 : i64, scratch_operands = 0 : i64, tpu.core_type = #tpu.core_type<tc>, window_params = [{transform_indices = @transform_0, window_bounds = array<i64: 128, 256>}, {pipeline_mode = #tpu.pipeline_mode<synchronous>, transform_indices = @transform_1, window_bounds = array<i64: 256, 128>}, {pipeline_mode = #tpu.pipeline_mode<synchronous>, transform_indices = @transform_2, window_bounds = array<i64: 128, 128>}, {transform_indices = @transform_3, window_bounds = array<i64: 128, 128>}]} {
    %c0 = arith.constant 0 : index
    %c0_0 = arith.constant 0 : index
    %0 = vector.load %arg1[%c0, %c0_0] : memref<128x256xbf16, #tpu.memory_space<vmem>>, vector<128x256xbf16>
    %c0_1 = arith.constant 0 : index
    %c0_2 = arith.constant 0 : index
    %1 = vector.load %arg2[%c0_1, %c0_2] : memref<256x128xbf16, #tpu.memory_space<vmem>>, vector<256x128xbf16>
    %cst = arith.constant dense<0.000000e+00> : vector<128x128xf32>
    %2 = tpu.matmul %0, %1, %cst {dimension_numbers = #tpu.dot_dimension_numbers<[1], [0], [0], [1], [0, 0, 1, 1], [], []>} : vector<128x256xbf16>, vector<256x128xbf16>, vector<128x128xf32> -> vector<128x128xf32>
    %cst_3 = arith.constant 0.000000e+00 : f32
    %3 = vector.broadcast %cst_3 : f32 to vector<128x128xf32>
    %4 = arith.cmpf ogt, %2, %3 : vector<128x128xf32>
    %cst_4 = arith.constant 2.000000e-01 : f32
    %5 = vector.broadcast %cst_4 : f32 to vector<128x128xf32>
    %6 = arith.mulf %5, %2 : vector<128x128xf32>
    %7 = arith.select %4, %2, %6 : vector<128x128xi1>, vector<128x128xf32>
    %8 = arith.truncf %7 : vector<128x128xf32> to vector<128x128xbf16>
    %c0_5 = arith.constant 0 : index
    %c0_6 = arith.constant 0 : index
    %9 = vector.load %arg3[%c0_5, %c0_6] : memref<128x128xbf16, #tpu.memory_space<vmem>>, vector<128x128xbf16>
    %cst_7 = arith.constant dense<0.000000e+00> : vector<128x128xf32>
    %10 = tpu.matmul %8, %9, %cst_7 {dimension_numbers = #tpu.dot_dimension_numbers<[1], [0], [0], [1], [0, 0, 1, 1], [], []>} : vector<128x128xbf16>, vector<128x128xbf16>, vector<128x128xf32> -> vector<128x128xf32>
    %11 = arith.truncf %10 : vector<128x128xf32> to vector<128x128xbf16>
    %c0_8 = arith.constant 0 : index
    %c0_9 = arith.constant 0 : index
    %12 = vector.load %arg4[%c0_8, %c0_9] : memref<128x128xbf16, #tpu.memory_space<vmem>>, vector<128x128xbf16>
    tpu.vector_store %arg4[%c0_8, %c0_9], %11 {strides = array<i32>} : memref<128x128xbf16, #tpu.memory_space<vmem>>, vector<128x128xbf16>,
    return
  }
  func.func @transform_0(%arg0: i32) -> (i32, i32) {
    %c0_i32 = arith.constant 0 : i32
    %c0_i32_0 = arith.constant 0 : i32
    return %arg0, %c0_i32 : i32, i32
  }
  func.func @transform_1(%arg0: i32) -> (i32, i32) {
    %c0_i32 = arith.constant 0 : i32
    %c0_i32_0 = arith.constant 0 : i32
    %c0_i32_1 = arith.constant 0 : i32
    return %c0_i32, %c0_i32_0 : i32, i32
  }
  func.func @transform_2(%arg0: i32) -> (i32, i32) {
    %c0_i32 = arith.constant 0 : i32
    %c0_i32_0 = arith.constant 0 : i32
    %c0_i32_1 = arith.constant 0 : i32
    return %c0_i32, %c0_i32_0 : i32, i32
  }
  func.func @transform_3(%arg0: i32) -> (i32, i32) {
    %c0_i32 = arith.constant 0 : i32
    %c0_i32_0 = arith.constant 0 : i32
    return %arg0, %c0_i32 : i32, i32
  }
}

</mosaic_0001>

<bundles_post_ra>
// kernel: decoder_forward.1
= control target key start
LH: loop header
LB: loop body
LE: loop exit
PB: predicated region body
PF: predicated region fallthrough
CT: control target
= control target key end

     0   :  { %8 = vsyncpa [#allocation3], 0  ;;  %s1761_s0 = inlined_call_operand.hbm [shape: bf16[256,256], index: 0, kind: input, shape index: {}]   ;;  %s1762_s1 = inlined_call_operand.hbm [shape: bf16[256,128], index: 1, kind: input, shape index: {}]   ;;  %s1763_s2 = inlined_call_operand.hbm [shape: bf16[128,128], index: 2, kind: input, shape index: {}]   ;;  %s1764_s3 = inlined_call_operand.hbm [shape: bf16[256,128], index: 3, kind: output, shape index: {}]  }
   0x1   :  { %10 = vsyncpa [#allocation3 + $0x1], 0 }
   0x2   :  { %11 = vsyncpa [#allocation6], 0 }
   0x3   :  { %12 = vsyncpa [#allocation4], 0 }
   0x4   :  { %14 = vsyncpa [#allocation4 + $0x1], 0  ;;  %s1508_s12 = smov 0   ;;  %s1510_s13 = smov 0  }
   0x5   :  { %s1512_s14 = smov 0   ;;  %s1514_s15 = smov 0  }
   0x6 LB: > { %s1529_s16 = sadd.s32 4294967295, %s1476_s15   ;;  %s946_s17 = sadd.s32 4294967294, %s1476_s15   ;;  %s1476_s15 = sphi %s1514_s15, %s1784_s15   ;;  %s1472_s14 = sphi %s1512_s14, %s1783_s14   ;;  %s1468_s13 = sphi %s1510_s13, %s1782_s13   ;;  %s1464_s12 = sphi %s1508_s12, %s1781_s12  }
   0x7   : > { %p40_p0 = scmp.ne.s32.totalorder %s1468_s13, %s1464_s12  ;;  %p1765_p1 = scmp.eq.s32.totalorder %s1529_s16, 0 }
   0x8   : > { %p112_p3 = scmp.eq.s32.totalorder %s946_s17, 1  ;;  %p947_p5 = scmp.ge.s32.totalorder %s1476_s15, 1 }
   0x9   : > { %p1538_p4 = por %p1765_p1, %p40_p0  ;;  %p119_p7 = scmp.lt.s32.totalorder %s1476_s15, 3 }
   0xa   : > { %p1543_p6 = por %p112_p3, %p40_p0  ;;  %s1478_s21 = smov [#allocation5]  }
   0xb   : > { %s1768_s18 = scalar_select %p1538_p4, 1, 0 }
   0xc   : > { %s1769_s19 = scalar_select %p1543_p6, 1, 0 }
   0xd   : > { %p1548_p8 = pnand %p947_p5, %p119_p7  ;;  %s131_s22 = sshll.u32 %s1478_s21, 4  ;;  %s1552_s22 = int_to_ptr.vmem [resolvable:$true] %s131_s22 }
   0xe   : > { %s1479_s24 = smov [#allocation7]   ;;  %s1320_s28 = scalar_lea.hbm %s1762_s1, 2048 }
   0xf   : > { %p1211_p9 = pneg %p1548_p8  ;;  %s144_s25 = sshll.u32 %s1479_s24, 4  ;;  %s1563_s25 = int_to_ptr.vmem [resolvable:$true] %s144_s25 }
  0x10   : > { %p1321_p12 = scmp.ne.s32.totalorder %s1762_s1, %s1320_s28  ;;  %p1327_p5 = scmp.lt.u32.totalorder %s1320_s28, %s1762_s1 }
  0x11   : > { %p1559_p11 = pnand %p1211_p9, %p1765_p1 }
  0x13   : > { %p1322_p13 = pneg %p1559_p11 }
  0x15   : > { %p1323_p0 = pnand %p1322_p13, %p1321_p12 }
  0x17   : > { %p1324_p3 = pneg %p1323_p0 }
  0x19   : > { %p1329_p7 = pnand %p1327_p5, %p1324_p3 }
  0x1b   : > { %1332 = shalt.err (!%p1329_p7)
}
  0x1c   : > { %s1333_s6 = scalar_lea.vmem %s1552_s22, 2048  ;;  %p1341_p2 = scmp.lt.s32.totalorder %s1552_s22, %s1552_s22 }
  0x1d   : > { %p1334_p9 = scmp.ne.s32.totalorder %s1552_s22, %s1333_s6  ;;  %p1342_p12 = scmp.lt.s32.totalorder %s1333_s6, %s1333_s6 }
  0x1f   : > { %p1336_p10 = pnand %p1334_p9, %p1322_p13  ;;  %p1343_p0 = por %p1342_p12, %p1341_p2 }
  0x21   : > { %p1337_p1 = pneg %p1336_p10 }
  0x23   : > { %p1344_p6 = pnand %p1343_p0, %p1337_p1 }
  0x25   : > { %1347 = shalt.err (!%p1344_p6)
}
  0x26   : > { %s1480_s7 = smov 64   ;;  %s1481_s8 = smov 4  }
  0x27   : > { %1214 = dma.hbm_to_vmem [thread:$0]  (!%p1559_p11), %s1762_s1, 2048, %s1552_s22, [#allocation6], %s1480_s7, %s1480_s7, %s1481_s8  }
  0x28   : > { %s1348_s21 = scalar_lea.hbm %s1763_s2, 1024 }
  0x29   : > { %p1349_p2 = scmp.ne.s32.totalorder %s1763_s2, %s1348_s21  ;;  %p1355_p10 = scmp.lt.u32.totalorder %s1348_s21, %s1763_s2 }
  0x2b   : > { %p1351_p1 = pnand %p1349_p2, %p1322_p13 }
  0x2d   : > { %p1352_p6 = pneg %p1351_p1 }
  0x2f   : > { %p1357_p3 = pnand %p1355_p10, %p1352_p6 }
  0x31   : > { %1360 = shalt.err (!%p1357_p3)
}
  0x32   : > { %s1361_s22 = scalar_lea.vmem %s1563_s25, 1024  ;;  %p1369_p12 = scmp.lt.s32.totalorder %s1563_s25, %s1563_s25 }
  0x33   : > { %p1362_p5 = scmp.ne.s32.totalorder %s1563_s25, %s1361_s22  ;;  %p1370_p0 = scmp.lt.s32.totalorder %s1361_s22, %s1361_s22 }
  0x35   : > { %p1364_p7 = pnand %p1362_p5, %p1322_p13  ;;  %p1371_p2 = por %p1370_p0, %p1369_p12 }
  0x37   : > { %p1365_p9 = pneg %p1364_p7 }
  0x39   : > { %p1372_p1 = pnand %p1371_p2, %p1365_p9 }
  0x3b   : > { %1375 = shalt.err (!%p1372_p1)
}
  0x3c   : > { %1217 = dma.hbm_to_vmem [thread:$0]  (!%p1559_p11), %s1763_s2, 1024, %s1563_s25, [#allocation6], %s1480_s7, %s1480_s7, %s1481_s8  }
  0x3d   : > { %s1618_s4 = sadd.s32 1, %s1476_s15   ;;  %s27_s23 = sadd.s32 1, %s1472_s14 }
  0x3e   : > { %s24_s5 = ssub.s32 %s1476_s15, %s1618_s4  ;;  %p34_p13 = scmp.ne.s32.totalorder %s1472_s14, %s1468_s13 }
  0x3f   : > { %p25_p6 = scmp.eq.s32.totalorder %s24_s5, 0  ;;  %p35_p10 = scmp.eq.s32.totalorder %s1476_s15, 0 }
  0x40   : > { %p1772_p3 = scmp.eq.s32.totalorder %s1529_s16, 1  ;;  %p1228_p7 = scmp.lt.s32.totalorder %s1476_s15, 2 }
  0x41   : > { %s1634_s9 = scalar_select %p25_p6, %s1472_s14, %s27_s23  }
  0x42   : > { %p1628_p5 = por %p1772_p3, %p34_p13  ;;  %p36_p9 = por %p35_p10, %p34_p13 }
  0x43   : > { %s158_s10 = sand.u32 1, %s1472_s14   ;;  %s1022_s25 = sshll.u32 %s1476_s15, 11 }
  0x44   : > { %s1773_s6 = scalar_select %p1628_p5, 1, 0 }
  0x45   : > { %s951_s11 = sshll.u32 %s158_s10, 7  ;;  %s1641_s17 = scalar_lea.hbm %s1761_s0, %s1022_s25 }
  0x46   : > { %s162_s21 = scalar_lea.vmem [#allocation2], %s951_s11  ;;  %p1645_p11 = pnand %p1228_p7, %p36_p9 }
  0x47   : > { %s170_s24 = sshll.u32 %s162_s21, 4  ;;  %s1649_s27 = scalar_lea.sflag [#allocation3], %s158_s10  ;;  %s1643_s24 = int_to_ptr.vmem [resolvable:$true] %s170_s24 }
  0x48   : > { %s1376_s28 = scalar_lea.hbm %s1641_s17, 2048  ;;  %p1378_p0 = pneg %p1645_p11 }
  0x49   : > { %p1377_p12 = scmp.ne.s32.totalorder %s1641_s17, %s1376_s28  ;;  %s1381_s30 = scalar_lea.hbm %s1761_s0, 4096 }
  0x4a   : > { %p1382_p13 = scmp.lt.u32.totalorder %s1641_s17, %s1761_s0  ;;  %p1383_p6 = scmp.lt.u32.totalorder %s1381_s30, %s1376_s28 }
  0x4b   : > { %p1379_p2 = pnand %p1378_p0, %p1377_p12  ;;  %p1385_p3 = scmp.lt.u32.totalorder %s1376_s28, %s1641_s17 }
  0x4c   : > { %p1384_p10 = por %p1383_p6, %p1382_p13 }
  0x4d   : > { %p1380_p1 = pneg %p1379_p2 }
  0x4e   : > { %p1386_p7 = por %p1385_p3, %p1384_p10 }
  0x50   : > { %p1387_p9 = pnand %p1386_p7, %p1380_p1 }
  0x52   : > { %1390 = shalt.err (!%p1387_p9)
}
  0x53   : > { %s1391_s10 = scalar_lea.vmem %s1643_s24, 2048  ;;  %s1482_s11 = smov [#allocation2]  }
  0x54   : > { %p1392_p12 = scmp.ne.s32.totalorder %s1643_s24, %s1391_s10  ;;  %s1396_s25 = sshll.u32 %s1482_s11, 4  ;;  %s1397_s25 = int_to_ptr.vmem [resolvable:$false] %s1396_s25 }
  0x55   : > { %s1398_s7 = scalar_lea.vmem %s1397_s25, 4096  ;;  %p1399_p4 = scmp.lt.s32.totalorder %s1643_s24, %s1397_s25 }
  0x56   : > { %p1394_p2 = pnand %p1392_p12, %p1378_p0  ;;  %p1400_p13 = scmp.lt.s32.totalorder %s1398_s7, %s1391_s10 }
  0x58   : > { %p1395_p5 = pneg %p1394_p2  ;;  %p1401_p6 = por %p1400_p13, %p1399_p4 }
  0x5a   : > { %p1402_p10 = pnand %p1401_p6, %p1395_p5 }
  0x5c   : > { %1405 = shalt.err (!%p1402_p10)
}
  0x5d   : > { %s1483_s8 = smov 128   ;;  %s1484_s21 = smov 8  }
  0x5e   : > { %1221 = dma.hbm_to_vmem [thread:$0]  (!%p1645_p11), %s1641_s17, 2048, %s1643_s24, %s1649_s27, %s1483_s8, %s1483_s8, %s1484_s21  }
  0x5f   : > { %182 = sbr.rel (%p1548_p8) target bundleno = 649 (0x289), region = 32  ;;  %s1680_s28 = sand.u32 (!%p1548_p8), 1, %s1468_s13  }
  0x60   : > { %s956_s22 = sshll.u32 (!%p1548_p8), %s1680_s28, 7  ;;  %s185_s29 = scalar_lea.sflag (!%p1548_p8), [#allocation3], %s1680_s28 }
  0x61   : > { %s1684_s30 = scalar_lea.vmem (!%p1548_p8), [#allocation2], %s956_s22  ;;  %p1775_p4 = scmp.ne.s32.totalorder (!%p1548_p8), %s1768_s18, 0 }
  0x66   : > { %1451 = dma.done.wait (%p1775_p4), %s185_s29, 2048  }
  0x67   : > { %1453 = vsyncadd (%p1775_p4), %s185_s29, 4294965248  ;;  %p1776_p5 = scmp.eq.s32.totalorder %s1529_s16, 0 }
  0x69   : > { %1455 = dma.done.wait (%p1776_p5), [#allocation6], 3072   ;;  %p1777_p8 = pmov %p1776_p5 }
  0x6a   : > { %v1272_v0 = vld [vmem:[#allocation5 + $0x40] sm:$0xff]   ;;  %v1274_v2 = vld [vmem:[#allocation5 + $0x48] sm:$0xff]   ;;  %v1276_v4 = vld [vmem:[#allocation5 + $0x50] sm:$0xff]   ;;  %s959_s18 = sshll.u32 %s1680_s28, 6  ;;  %s1039_s24 = sshll.u32 %s1529_s16, 10 }
  0x6b   : > { %1457 = vsyncadd (%p1777_p8), [#allocation6], 4294964224  ;;  %v1273_v1 = vld [vmem:[#allocation5] sm:$0xff]   ;;  %1087 = vmatprep.subr.bf16.mxu0 %v1272_v0  ;;  %v1275_v3 = vld [vmem:[#allocation5 + $0x8] sm:$0xff]   ;;  %s218_s20 = scalar_lea.vmem [#allocation8], %s959_s18  ;;  %s1717_s23 = scalar_lea.hbm %s1764_s3, %s1039_s24 }
  0x6c   : > { %1088 = vmatpush3.bf16.msra.mxu0 %v1273_v1  ;;  %v1277_v5 = vld [vmem:[#allocation5 + $0x10] sm:$0xff]   ;;  %v1278_v6 = vld [vmem:[#allocation5 + $0x58] sm:$0xff]   ;;  %v1280_v8 = vld [vmem:[#allocation5 + $0x60] sm:$0xff]   ;;  %s854_s17 = sshll.u32 %s218_s20, 4  ;;  %s841_s5 = scalar_lea.sflag [#allocation4], %s1680_s28  ;;  %s1712_s17 = int_to_ptr.vmem [resolvable:$true] %s854_s17 }
  0x6d   : > { %1089 = vmatprep.subr.bf16.mxu0 %v1274_v2  ;;  %v1279_v7 = vld [vmem:[#allocation5 + $0x18] sm:$0xff]   ;;  %v1281_v9 = vld [vmem:[#allocation5 + $0x20] sm:$0xff]   ;;  %v1282_v10 = vld [vmem:[#allocation5 + $0x68] sm:$0xff]   ;;  %s1406_s10 = scalar_lea.vmem %s1712_s17, 1024  ;;  %p1778_p0 = scmp.ne.s32.totalorder %s1773_s6, 0 }
  0x6e   : > { %v1290_v11 = vld [vmem:[%s1684_s30 + $0x4] ss:$8 sps:$4 sm:$0xff]   ;;  %v1284_v13 = vld [vmem:[#allocation5 + $0x70] sm:$0xff]   ;;  %v1286_v15 = vld [vmem:[#allocation5 + $0x78] sm:$0xff]   ;;  %p1407_p11 = scmp.ne.s32.totalorder %s1712_s17, %s1406_s10  ;;  %s1485_s16 = smov [#allocation8]  }
  0x6f   : > { %v1283_v12 = vld [vmem:[#allocation5 + $0x28] sm:$0xff]   ;;  %478 = vmatprep.mubr.bf16.mxu0 %v1290_v11  ;;  %v1285_v14 = vld [vmem:[#allocation5 + $0x30] sm:$0xff]   ;;  %v1287_v16 = vld [vmem:[#allocation5 + $0x38] sm:$0xff]   ;;  %s1410_s11 = sshll.u32 %s1485_s16, 4  ;;  %s1411_s11 = int_to_ptr.vmem [resolvable:$false] %s1410_s11 }
  0x70   : > { %1090 = vmatpush3.bf16.msra.mxu0 %v1275_v3  ;;  %v1312_v17 = vld [vmem:[#allocation7] sm:$0xff]   ;;  %v1313_v19 = vld [vmem:[#allocation7 + $0x8] sm:$0xff]   ;;  %v1291_v20 = vld [vmem:[%s1684_s30 + $0x14] ss:$8 sps:$4 sm:$0xff]   ;;  %p1408_p1 = pnand %p1407_p11, %p1778_p0  ;;  %s1412_s25 = scalar_lea.vmem %s1411_s11, 2048 }
  0x71   : > { %1091 = vmatprep.subr.bf16.mxu0 %v1276_v4  ;;  %v1288_v18 = vld [vmem:[%s1684_s30] ss:$8 sps:$4 sm:$0xff]   ;;  %1167 = vmatprep.subr.bf16.mxu1 %v1312_v17  ;;  %v1314_v21 = vld [vmem:[#allocation7 + $0x10] sm:$0xff]   ;;  %v1315_v22 = vld [vmem:[#allocation7 + $0x18] sm:$0xff]   ;;  %p1413_p7 = scmp.lt.s32.totalorder %s1712_s17, %s1411_s11  ;;  %p1414_p9 = scmp.lt.s32.totalorder %s1412_s25, %s1406_s10 }
  0x72   : > { %1168 = vmatpush3.bf16.msra.mxu1 %v1312_v17  ;;  %v1293_v23 = vld [vmem:[%s1684_s30 + $0x10] ss:$8 sps:$4 sm:$0xff]   ;;  %v1294_v24 = vld [vmem:[%s1684_s30 + $0x24] ss:$8 sps:$4 sm:$0xff]   ;;  %v1296_v25 = vld [vmem:[%s1684_s30 + $0x20] ss:$8 sps:$4 sm:$0xff]   ;;  %p1409_p3 = pneg %p1408_p1 }
  0x73   : > { %1169 = vmatprep.subr.bf16.mxu1 %v1313_v19  ;;  %v1297_v26 = vld [vmem:[%s1684_s30 + $0x34] ss:$8 sps:$4 sm:$0xff]   ;;  %v1299_v27 = vld [vmem:[%s1684_s30 + $0x30] ss:$8 sps:$4 sm:$0xff]   ;;  %v1300_v28 = vld [vmem:[%s1684_s30 + $0x44] ss:$8 sps:$4 sm:$0xff]   ;;  %p1415_p12 = por %p1414_p9, %p1413_p7 }
  0x74   : > { %1092 = vmatpush3.bf16.msra.mxu0 %v1277_v5  ;;  %v1302_v29 = vld [vmem:[%s1684_s30 + $0x40] ss:$8 sps:$4 sm:$0xff]   ;;  %v1303_v30 = vld [vmem:[%s1684_s30 + $0x54] ss:$8 sps:$4 sm:$0xff]   ;;  %v1305_v31 = vld [vmem:[%s1684_s30 + $0x50] ss:$8 sps:$4 sm:$0xff]  }
  0x75   : > { %1093 = vmatprep.subr.bf16.mxu0 %v1278_v6  ;;  %v1306_v32 = vld [vmem:[%s1684_s30 + $0x64] ss:$8 sps:$4 sm:$0xff]   ;;  %v1308_v33 = vld [vmem:[%s1684_s30 + $0x60] ss:$8 sps:$4 sm:$0xff]   ;;  %v1309_v34 = vld [vmem:[%s1684_s30 + $0x74] ss:$8 sps:$4 sm:$0xff]   ;;  %p1416_p2 = pnand %p1415_p12, %p1409_p3 }
  0x76   : > { %1170 = vmatpush3.bf16.msra.mxu1 %v1313_v19  ;;  %v1311_v35 = vld [vmem:[%s1684_s30 + $0x70] ss:$8 sps:$4 sm:$0xff]   ;;  %v1316_v36 = vld [vmem:[#allocation7 + $0x20] sm:$0xff]   ;;  %v1317_v37 = vld [vmem:[#allocation7 + $0x28] sm:$0xff]  }
  0x77   : > { %1171 = vmatprep.subr.bf16.mxu1 %v1314_v21  ;;  %v1318_v38 = vld [vmem:[#allocation7 + $0x30] sm:$0xff]   ;;  %v1319_v39 = vld [vmem:[#allocation7 + $0x38] sm:$0xff]  }
  0x78   : > { %1094 = vmatpush3.bf16.msra.mxu0 %v1279_v7 }
  0x79   : > { %1095 = vmatprep.subr.bf16.mxu0 %v1280_v8 }
  0x7a   : > { %1172 = vmatpush3.bf16.msra.mxu1 %v1314_v21 }
  0x7b   : > { %1173 = vmatprep.subr.bf16.mxu1 %v1315_v22 }
  0x7c   : > { %1096 = vmatpush3.bf16.msra.mxu0 %v1281_v9 }
  0x7d   : > { %1097 = vmatprep.subr.bf16.mxu0 %v1282_v10 }
  0x7e   : > { %1174 = vmatpush3.bf16.msra.mxu1 %v1315_v22 }
  0x7f   : > { %1175 = vmatprep.subr.bf16.mxu1 %v1316_v36 }
  0x80   : > { %1098 = vmatpush3.bf16.msra.mxu0 %v1283_v12 }
  0x81   : > { %1099 = vmatprep.subr.bf16.mxu0 %v1284_v13 }
  0x82   : > { %1176 = vmatpush3.bf16.msra.mxu1 %v1316_v36 }
  0x83   : > { %1177 = vmatprep.subr.bf16.mxu1 %v1317_v37 }
  0x84   : > { %1100 = vmatpush3.bf16.msra.mxu0 %v1285_v14 }
  0x85   : > { %1101 = vmatprep.subr.bf16.mxu0 %v1286_v15 }
  0x86   : > { %1178 = vmatpush3.bf16.msra.mxu1 %v1317_v37 }
  0x87   : > { %1179 = vmatprep.subr.bf16.mxu1 %v1318_v38 }
  0x88   : > { %1102 = vmatpush3.bf16.msra.mxu0 %v1287_v16 }
  0x8a   : > { %1180 = vmatpush3.bf16.msra.mxu1 %v1318_v38 }
  0x8b   : > { %479 = vmatmul.mubr.bf16.vlgmr.msra.gmra.mrb[0].mxu0 %v1288_v18  ;;  %1181 = vmatprep.subr.bf16.mxu1 %v1319_v39 }
  0x8c   : > { %486 = vmatprep.mubr.bf16.mxu0 %v1291_v20 }
  0x8e   : > { %1182 = vmatpush3.bf16.msra.mxu1 %v1319_v39 }
  0x93   : > { %487 = vmatmul.mubr.bf16.gmra.mrb[4].mxu0 %v1293_v23 }
  0x94   : > { %494 = vmatprep.mubr.bf16.mxu0 %v1294_v24 }
  0x9b   : > { %495 = vmatmul.mubr.bf16.gmra.mrb[8].mxu0 %v1296_v25 }
  0x9c   : > { %502 = vmatprep.mubr.bf16.mxu0 %v1297_v26 }
  0xa3   : > { %503 = vmatmul.mubr.bf16.gmra.mrb[12].mxu0 %v1299_v27 }
  0xa4   : > { %510 = vmatprep.mubr.bf16.mxu0 %v1300_v28 }
  0xab   : > { %511 = vmatmul.mubr.bf16.gmra.mrb[16].mxu0 %v1302_v29 }
  0xac   : > { %518 = vmatprep.mubr.bf16.mxu0 %v1303_v30 }
  0xb3   : > { %519 = vmatmul.mubr.bf16.gmra.mrb[20].mxu0 %v1305_v31 }
  0xb4   : > { %526 = vmatprep.mubr.bf16.mxu0 %v1306_v32 }
  0xbb   : > { %527 = vmatmul.mubr.bf16.gmra.mrb[24].mxu0 %v1308_v33 }
  0xbc   : > { %534 = vmatprep.mubr.bf16.mxu0 %v1309_v34 }
  0xc3   : > { %535 = vmatmul.mubr.bf16.gmra.mrb[28].mxu0 %v1311_v35 }
 0x15e   : > { %v1103_v40 = vpop.f32.mrb[0].mxu0 }
 0x15f   : > { %v1104_v41 = vpop.f32.mrb[1].mxu0 }
 0x160   : > { %v1105_v42 = vadd.f32 %v1104_v41, %v1103_v40  ;;  %v1106_v43 = vpop.f32.mrb[2].mxu0 }
 0x161   : > { %v1107_v44 = vpop.f32.mrb[3].mxu0 }
 0x162   : > { %v559_v45 = vmul.f32 0.2, %v1105_v42  ;;  %v1108_v46 = vadd.f32 %v1107_v44, %v1106_v43  ;;  %vm543_vm0 = vcmp.gt.f32.partialorder %v1105_v42, 0.0 }
 0x164   : > { %v560_v47 = vmul.f32 0.2, %v1108_v46  ;;  %vm544_vm1 = vcmp.gt.f32.partialorder %v1108_v46, 0.0  ;;  %v575_v49 = vsel %vm543_vm0, %v1105_v42, %v559_v45 }
 0x166   : > { %v1109_v48 = vpop.f32.mrb[4].mxu0  ;;  %v576_v50 = vsel %vm544_vm1, %v1108_v46, %v560_v47 }
 0x167   : > { %v1110_v51 = vpop.f32.mrb[5].mxu0  ;;  %v591_v52 = vpack.c.bf16 %v576_v50, %v575_v49 }
 0x168   : > { %v1111_v53 = vadd.f32 %v1110_v51, %v1109_v48  ;;  %v1112_v54 = vpop.f32.mrb[6].mxu0 }
 0x169   : > { %v1113_v55 = vpop.f32.mrb[7].mxu0  ;;  %1183 = vmatprep.mubr.bf16.mxu1 %v591_v52 }
 0x16a   : > { %v561_v56 = vmul.f32 0.2, %v1111_v53  ;;  %v1114_v57 = vadd.f32 %v1113_v55, %v1112_v54  ;;  %vm545_vm2 = vcmp.gt.f32.partialorder %v1111_v53, 0.0 }
 0x16c   : > { %vm546_vm3 = vcmp.gt.f32.partialorder %v1114_v57, 0.0  ;;  %v562_v58 = vmul.f32 0.2, %v1114_v57  ;;  %v577_v60 = vsel %vm545_vm2, %v1111_v53, %v561_v56 }
 0x16e   : > { %v1115_v59 = vpop.f32.mrb[8].mxu0  ;;  %v578_v61 = vsel %vm546_vm3, %v1114_v57, %v562_v58 }
 0x16f   : > { %v1116_v62 = vpop.f32.mrb[9].mxu0  ;;  %v592_v63 = vpack.c.bf16 %v578_v61, %v577_v60 }
 0x170   : > { %v1117_v0 = vadd.f32 %v1116_v62, %v1115_v59  ;;  %v1118_v1 = vpop.f32.mrb[10].mxu0 }
 0x171   : > { %v1119_v2 = vpop.f32.mrb[11].mxu0  ;;  %1184 = vmatmul.mubr.bf16.vlgmr.msra.gmra.mrb[0].mxu1 %v592_v63 }
 0x172   : > { %v563_v3 = vmul.f32 0.2, %v1117_v0  ;;  %v1120_v4 = vadd.f32 %v1119_v2, %v1118_v1  ;;  %vm547_vm4 = vcmp.gt.f32.partialorder %v1117_v0, 0.0 }
 0x174   : > { %vm548_vm5 = vcmp.gt.f32.partialorder %v1120_v4, 0.0  ;;  %v564_v5 = vmul.f32 0.2, %v1120_v4  ;;  %v579_v7 = vsel %vm547_vm4, %v1117_v0, %v563_v3 }
 0x176   : > { %v1121_v6 = vpop.f32.mrb[12].mxu0  ;;  %v580_v8 = vsel %vm548_vm5, %v1120_v4, %v564_v5 }
 0x177   : > { %v1122_v9 = vpop.f32.mrb[13].mxu0  ;;  %v593_v10 = vpack.c.bf16 %v580_v8, %v579_v7 }
 0x178   : > { %v1123_v11 = vadd.f32 %v1122_v9, %v1121_v6  ;;  %v1124_v12 = vpop.f32.mrb[14].mxu0 }
 0x179   : > { %v1125_v13 = vpop.f32.mrb[15].mxu0  ;;  %1187 = vmatprep.mubr.bf16.mxu1 %v593_v10 }
 0x17a   : > { %v565_v14 = vmul.f32 0.2, %v1123_v11  ;;  %v1126_v15 = vadd.f32 %v1125_v13, %v1124_v12  ;;  %vm549_vm6 = vcmp.gt.f32.partialorder %v1123_v11, 0.0 }
 0x17c   : > { %vm550_vm7 = vcmp.gt.f32.partialorder %v1126_v15, 0.0  ;;  %v566_v16 = vmul.f32 0.2, %v1126_v15  ;;  %v581_v18 = vsel %vm549_vm6, %v1123_v11, %v565_v14 }
 0x17e   : > { %v1127_v17 = vpop.f32.mrb[16].mxu0  ;;  %v582_v19 = vsel %vm550_vm7, %v1126_v15, %v566_v16 }
 0x17f   : > { %v1128_v20 = vpop.f32.mrb[17].mxu0  ;;  %v594_v21 = vpack.c.bf16 %v582_v19, %v581_v18 }
 0x180   : > { %v1129_v22 = vadd.f32 %v1128_v20, %v1127_v17  ;;  %v1130_v23 = vpop.f32.mrb[18].mxu0 }
 0x181   : > { %v1131_v24 = vpop.f32.mrb[19].mxu0  ;;  %1188 = vmatmul.mubr.bf16.gmra.mrb[4].mxu1 %v594_v21 }
 0x182   : > { %v567_v25 = vmul.f32 0.2, %v1129_v22  ;;  %v1132_v26 = vadd.f32 %v1131_v24, %v1130_v23  ;;  %vm551_vm8 = vcmp.gt.f32.partialorder %v1129_v22, 0.0 }
 0x184   : > { %vm552_vm9 = vcmp.gt.f32.partialorder %v1132_v26, 0.0  ;;  %v568_v27 = vmul.f32 0.2, %v1132_v26  ;;  %v583_v29 = vsel %vm551_vm8, %v1129_v22, %v567_v25 }
 0x186   : > { %v1133_v28 = vpop.f32.mrb[20].mxu0  ;;  %v584_v30 = vsel %vm552_vm9, %v1132_v26, %v568_v27 }
 0x187   : > { %v1134_v31 = vpop.f32.mrb[21].mxu0  ;;  %v595_v32 = vpack.c.bf16 %v584_v30, %v583_v29 }
 0x188   : > { %v1135_v33 = vadd.f32 %v1134_v31, %v1133_v28  ;;  %v1136_v34 = vpop.f32.mrb[22].mxu0 }
 0x189   : > { %v1137_v35 = vpop.f32.mrb[23].mxu0  ;;  %1191 = vmatprep.mubr.bf16.mxu1 %v595_v32 }
 0x18a   : > { %v569_v36 = vmul.f32 0.2, %v1135_v33  ;;  %v1138_v37 = vadd.f32 %v1137_v35, %v1136_v34  ;;  %vm553_vm10 = vcmp.gt.f32.partialorder %v1135_v33, 0.0 }
 0x18c   : > { %vm554_vm11 = vcmp.gt.f32.partialorder %v1138_v37, 0.0  ;;  %v570_v38 = vmul.f32 0.2, %v1138_v37  ;;  %v585_v40 = vsel %vm553_vm10, %v1135_v33, %v569_v36 }
 0x18e   : > { %v1139_v39 = vpop.f32.mrb[24].mxu0  ;;  %v586_v41 = vsel %vm554_vm11, %v1138_v37, %v570_v38 }
 0x18f   : > { %v1140_v42 = vpop.f32.mrb[25].mxu0  ;;  %v596_v43 = vpack.c.bf16 %v586_v41, %v585_v40 }
 0x190   : > { %v1141_v44 = vadd.f32 %v1140_v42, %v1139_v39  ;;  %v1142_v45 = vpop.f32.mrb[26].mxu0 }
 0x191   : > { %v1143_v46 = vpop.f32.mrb[27].mxu0  ;;  %1192 = vmatmul.mubr.bf16.gmra.mrb[8].mxu1 %v596_v43 }
 0x192   : > { %v571_v47 = vmul.f32 0.2, %v1141_v44  ;;  %v1144_v48 = vadd.f32 %v1143_v46, %v1142_v45  ;;  %vm555_vm12 = vcmp.gt.f32.partialorder %v1141_v44, 0.0 }
 0x194   : > { %vm556_vm13 = vcmp.gt.f32.partialorder %v1144_v48, 0.0  ;;  %v572_v49 = vmul.f32 0.2, %v1144_v48  ;;  %v587_v51 = vsel %vm555_vm12, %v1141_v44, %v571_v47 }
 0x196   : > { %v1145_v50 = vpop.f32.mrb[28].mxu0  ;;  %v588_v52 = vsel %vm556_vm13, %v1144_v48, %v572_v49 }
 0x197   : > { %v1146_v53 = vpop.f32.mrb[29].mxu0  ;;  %v597_v54 = vpack.c.bf16 %v588_v52, %v587_v51 }
 0x198   : > { %v1147_v55 = vadd.f32 %v1146_v53, %v1145_v50  ;;  %v1148_v56 = vpop.f32.mrb[30].mxu0 }
 0x199   : > { %v1149_v57 = vpop.f32.mrb[31].mxu0  ;;  %1195 = vmatprep.mubr.bf16.mxu1 %v597_v54 }
 0x19a   : > { %v573_v58 = vmul.f32 0.2, %v1147_v55  ;;  %v1150_v59 = vadd.f32 %v1149_v57, %v1148_v56  ;;  %vm557_vm14 = vcmp.gt.f32.partialorder %v1147_v55, 0.0 }
 0x19c   : > { %vm558_vm15 = vcmp.gt.f32.partialorder %v1150_v59, 0.0  ;;  %v574_v60 = vmul.f32 0.2, %v1150_v59  ;;  %v589_v61 = vsel %vm557_vm14, %v1147_v55, %v573_v58 }
 0x19e   : > { %v590_v62 = vsel %vm558_vm15, %v1150_v59, %v574_v60 }
 0x19f   : > { %v598_v63 = vpack.c.bf16 %v590_v62, %v589_v61 }
 0x1a1   : > { %1196 = vmatmul.mubr.bf16.gmra.mrb[12].mxu1 %v598_v63 }
 0x244   : > { %v1185_v0 = vpop.f32.mrb[0].mxu1 }
 0x245   : > { %v697_v1 = vpop.f32.mrb[1].mxu1 }
 0x246   : > { %v1186_v2 = vpop.f32.mrb[2].mxu1 }
 0x247   : > { %v1048_v3 = vpack.c.bf16 %v1186_v2, %v1185_v0  ;;  %v700_v4 = vpop.f32.mrb[3].mxu1 }
 0x248   : > { %v1043_v5 = vpack.c.bf16 %v700_v4, %v697_v1 }
 0x249   : > { %1080 = vst [vmem:[%s218_s20 + $0x8] sm:$0xff] %v1048_v3  }
 0x24a   : > { %1044 = vst [vmem:[%s218_s20] sm:$0xff] %v1043_v5  }
 0x254   : > { %v1189_v6 = vpop.f32.mrb[4].mxu1 }
 0x255   : > { %v713_v7 = vpop.f32.mrb[5].mxu1 }
 0x256   : > { %v1190_v8 = vpop.f32.mrb[6].mxu1 }
 0x257   : > { %v1058_v9 = vpack.c.bf16 %v1190_v8, %v1189_v6  ;;  %v716_v10 = vpop.f32.mrb[7].mxu1 }
 0x258   : > { %v1053_v11 = vpack.c.bf16 %v716_v10, %v713_v7 }
 0x259   : > { %1082 = vst [vmem:[%s218_s20 + $0x18] sm:$0xff] %v1058_v9  }
 0x25a   : > { %1081 = vst [vmem:[%s218_s20 + $0x10] sm:$0xff] %v1053_v11  }
 0x264   : > { %v1193_v12 = vpop.f32.mrb[8].mxu1 }
 0x265   : > { %v729_v13 = vpop.f32.mrb[9].mxu1 }
 0x266   : > { %v1194_v14 = vpop.f32.mrb[10].mxu1 }
 0x267   : > { %v1068_v15 = vpack.c.bf16 %v1194_v14, %v1193_v12  ;;  %v732_v16 = vpop.f32.mrb[11].mxu1 }
 0x268   : > { %v1063_v17 = vpack.c.bf16 %v732_v16, %v729_v13 }
 0x269   : > { %1084 = vst [vmem:[%s218_s20 + $0x28] sm:$0xff] %v1068_v15  }
 0x26a   : > { %1083 = vst [vmem:[%s218_s20 + $0x20] sm:$0xff] %v1063_v17  }
 0x274   : > { %v1197_v18 = vpop.f32.mrb[12].mxu1 }
 0x275   : > { %v745_v19 = vpop.f32.mrb[13].mxu1 }
 0x276   : > { %v1198_v20 = vpop.f32.mrb[14].mxu1 }
 0x277   : > { %v1078_v21 = vpack.c.bf16 %v1198_v20, %v1197_v18  ;;  %v748_v22 = vpop.f32.mrb[15].mxu1 }
 0x278   : > { %v1073_v23 = vpack.c.bf16 %v748_v22, %v745_v19 }
 0x279   : > { %1086 = vst [vmem:[%s218_s20 + $0x38] sm:$0xff] %v1078_v21  }
 0x27a   : > { %1085 = vst [vmem:[%s218_s20 + $0x30] sm:$0xff] %v1073_v23  }
 0x27b   : > { %1419 = shalt.err (!%p1416_p2)
}
 0x27c   : > { %s1420_s7 = scalar_lea.hbm %s1717_s23, 1024  ;;  %s1424_s22 = scalar_lea.hbm %s1764_s3, 2048 }
 0x27d   : > { %p1421_p13 = scmp.ne.s32.totalorder %s1717_s23, %s1420_s7  ;;  %p1425_p4 = scmp.lt.u32.totalorder %s1717_s23, %s1764_s3 }
 0x27e   : > { %p1426_p5 = scmp.lt.u32.totalorder %s1424_s22, %s1420_s7  ;;  %p1428_p11 = scmp.lt.u32.totalorder %s1420_s7, %s1717_s23 }
 0x27f   : > { %p1422_p6 = pnand %p1421_p13, %p1778_p0 }
 0x280   : > { %p1427_p8 = por %p1426_p5, %p1425_p4 }
 0x281   : > { %p1423_p10 = pneg %p1422_p6 }
 0x282   : > { %p1429_p1 = por %p1428_p11, %p1427_p8 }
 0x284   : > { %p1430_p3 = pnand %p1429_p1, %p1423_p10 }
 0x286   : > { %1433 = shalt.err (!%p1430_p3)
}
 0x287   : > { %s1486_s18 = smov 64   ;;  %s1487_s20 = smov 4  }
 0x288   : > { %1209 = dma.vmem_to_hbm [thread:$0]  (%p1778_p0), %s1712_s17, 1024, %s1717_s23, %s841_s5, %s1486_s18, %s1486_s18, %s1487_s20  }
 0x289 PF: > { %s869_s24 = sand.u32 1, %s1464_s12   ;;  %p1779_p7 = scmp.ne.s32.totalorder %s1769_s19, 0 }
 0x28a   : > { %p1780_p9 = scmp.ge.s32.totalorder %s1476_s15, 2  ;;  %s870_s26 = scalar_lea.sflag [#allocation4], %s869_s24 }
 0x28c   : > { %p1223_p12 = pnand %p1780_p9, %p1779_p7 }
 0x28e   : > { %1459 = dma.done.wait (!%p1223_p12), %s870_s26, 1024  }
 0x28f   : > { %1461 = vsyncadd (!%p1223_p12), %s870_s26, 4294966272  ;;  %p17_p2 = scmp.ge.s32.totalorder %s1618_s4, 4   ;;  %s1781_s12 = smov %s1468_s13 }
 0x290   : > { %s1782_s13 = smov %s1472_s14  ;;  %s1783_s14 = smov %s1634_s9 }
 0x291   : > { %s1784_s15 = smov %s1618_s4  ;;  %19 = sbr.rel (!%p17_p2) target bundleno = 6 (0x6), region = 85 }
 0x298   :  { %875 = vsyncpa [#allocation3], 1 }
 0x299   :  { %877 = vsyncpa [#allocation3 + $0x1], 1 }
 0x29a   :  { %878 = vsyncpa [#allocation6], 1 }
 0x29b   :  { %879 = vsyncpa [#allocation4], 1 }
 0x29c   :  { %881 = vsyncpa [#allocation4 + $0x1], 1 }

</bundles_post_ra>
